<compile_context>
chip_gen: v7x
topology: tpu7x:2x2x1
jax: 0.10.0
libtpu: 0.0.40
codegen_flags: <defaults>
</compile_context>

<pallas_src>
import jax
import jax.numpy as jnp
import numpy as np
from jax.experimental import pallas as pl
from jax.experimental.pallas import tpu as pltpu


def _round_up(n, m):
    return ((n + m - 1) // m) * m


def _default_min_grid():
    # v7x has 2 TensorCores that split "parallel" grid axes; keep >= 2 batch blocks
    # there (when the batch allows) so the second core isn't idle.  v5e/v6e: 1 TC.
    try:
        kind = jax.devices()[0].device_kind.lower()
        return 2 if "v7" in kind else 1
    except Exception:
        return 1


def _make_kernel(K2, W, mxu_dtype):
    """One grid step = one block of Bt sequences, batch folded into the lane axis.

    Pre-packed operands (biases folded into the matmuls, no bias adds in-kernel):
      x_ref  : (1, K1*Cp, W1w)  host-side conv1 im2col of the input block; the ones
               channel row carries conv1's bias via the matching w1 column.
      w1_ref : (C1p, K1*Cp)     conv1 weight; row C1 is a "ones propagator" so
               y1[C1, :] == 1 and conv2's bias folds into w2.
      w2_ref : (Hp,  K2*C1p)    conv2 weight (+ bias column, + ones-prop row H).
      wo_ref : (Op,  Hp)        output linear weight (+ bias column at h = H).
    """

    def kernel(x_ref, w1_ref, w2_ref, wo_ref, out_ref):
        # Conv1 + ReLU: one wide MXU dot, rhs read straight from the input block
        # (no in-kernel lane shifts for conv1).
        y1 = jnp.dot(w1_ref[...], x_ref[0], preferred_element_type=jnp.float32)
        y1 = jnp.maximum(y1, 0.0)                                   # (C1p, W1w) f32
        y1m = y1.astype(mxu_dtype)

        # Conv2 + ReLU: im2col over the K2 taps (the only remaining lane shifts).
        rhs2 = jnp.concatenate([y1m[:, k:k + W] for k in range(K2)], axis=0)
        y2 = jnp.dot(w2_ref[...], rhs2, preferred_element_type=jnp.float32)
        y2 = jnp.maximum(y2, 0.0)                                   # (Hp, W) f32

        # Output linear (bias folded via the ones row y2[H, :]); unmasked (Op, W) store.
        out_ref[0] = jnp.dot(wo_ref[...], y2.astype(mxu_dtype),
                             preferred_element_type=jnp.float32)    # (Op, W)

    return kernel


def make_cnn_forward(params, x_shape, window_size, *, lane_target=4096,
                     mxu_dtype=jnp.bfloat16, min_grid=None):
    """Pack the weights once and return a jitted forward(x) for a fixed x_shape.

    params: (w1 (C1,C,K1), b1 (C1,1), w2 (H,C1,K2), b2 (H,1), wo (O,H), bo (O,1))
            (conv weights in torch Conv1d layout: (C_out, C_in, K)).
    forward(x): x (N, C, L) -> (N*(L - window_size + 1), O), matching CNN.forward
    with bkf=False.
    """
    w1, b1, w2, b2, wo, bo = params
    N, C, L = x_shape
    C1, _, K1 = w1.shape
    H, _, K2 = w2.shape
    O = wo.shape[0]
    L1 = L - (K1 - 1)
    L2 = L1 - (K2 - 1)
    # Guard the slice/contamination coupling: only columns t < L2 per sequence slot
    # are valid (later columns read into the next sequence / pad lanes).
    assert window_size == K1 + K2 - 1
    assert 1 <= L2 and window_size <= L, "window must fit inside the sequence"

    if min_grid is None:
        min_grid = _default_min_grid()

    # ---- batch-block sizing: big lane slabs; keep >= min_grid blocks if possible ----
    Bt = max(1, min(N, lane_target // max(L, 1)))   # sequences folded per grid step
    G = -(-N // Bt)
    if G < min_grid and N >= min_grid:              # keep both v7x TensorCores busy
        Bt = -(-N // min_grid)
        G = -(-N // Bt)
    Npad = G * Bt
    W = _round_up(Bt * L, 128)                      # lane-dense output width per block
    W1w = _round_up(W + K2 - 1, 128)                # whole-vreg conv1 output width
    Lx = W1w + (K1 - 1)                             # padded per-block input length

    # ---- channel padding (one padded row per stage reserved for the bias fold) ----
    Cp = _round_up(C + 1, 8)                        # input row C == all-ones channel
    C1p = _round_up(C1 + 1, 8)                      # y1 row C1 == all-ones
    Hp = _round_up(H + 1, 8)                        # y2 row H  == all-ones
    Op = _round_up(O, 8)                            # unmasked full-vreg output stores

    f32 = jnp.float32

    # ---- conv1 weight: im2col layout, bias folded into the ones-channel column ----
    w1f = jnp.zeros((C1p, K1 * Cp), f32)
    for k in range(K1):
        w1f = w1f.at[:C1, k * Cp:k * Cp + C].set(w1[:, :, k].astype(f32))
    w1f = w1f.at[:C1, C].set(b1[:, 0].astype(f32))   # b1 via ones input channel (tap 0)
    w1f = w1f.at[C1, C].set(1.0)                     # ones propagator -> y1[C1, :] == 1

    # ---- conv2 weight ----
    w2f = jnp.zeros((Hp, K2 * C1p), f32)
    for k in range(K2):
        w2f = w2f.at[:H, k * C1p:k * C1p + C1].set(w2[:, :, k].astype(f32))
    w2f = w2f.at[:H, C1].set(b2[:, 0].astype(f32))   # b2 via ones row of y1 (tap 0)
    w2f = w2f.at[H, C1].set(1.0)                     # ones propagator -> y2[H, :] == 1

    # ---- output linear weight ----
    wof = jnp.zeros((Op, Hp), f32)
    wof = wof.at[:O, :H].set(wo.astype(f32))
    wof = wof.at[:O, H].set(bo[:, 0].astype(f32))    # bo via ones row of y2

    w1f = w1f.astype(mxu_dtype)
    w2f = w2f.astype(mxu_dtype)
    wof = wof.astype(mxu_dtype)

    kernel = _make_kernel(K2, W, mxu_dtype)

    pc = pl.pallas_call(
        kernel,
        out_shape=jax.ShapeDtypeStruct((G, Op, W), jnp.float32),
        grid=(G,),
        in_specs=[
            pl.BlockSpec((1, K1 * Cp, W1w), lambda g: (g, 0, 0)),   # input block (im2col)
            pl.BlockSpec((C1p, K1 * Cp), lambda g: (0, 0)),         # resident weights
            pl.BlockSpec((Hp, K2 * C1p), lambda g: (0, 0)),
            pl.BlockSpec((Op, Hp), lambda g: (0, 0)),
        ],
        out_specs=pl.BlockSpec((1, Op, W), lambda g: (g, 0, 0)),
        compiler_params=pltpu.CompilerParams(
            dimension_semantics=("parallel",)),      # independent batch blocks (2 TCs)
    )

    @jax.jit
    def forward(x):
        # Pack the input block: batch folded into lanes (column b*L + t), padded
        # channels, ones-channel at row C, then host-side conv1 im2col.
        xp = jnp.pad(x.astype(f32), ((0, Npad - N), (0, 0), (0, 0)))
        xblk = xp.reshape(G, Bt, C, L).transpose(0, 2, 1, 3).reshape(G, C, Bt * L)
        xblk = jnp.pad(xblk, ((0, 0), (0, 0), (0, Lx - Bt * L)))
        ones = jnp.ones((G, 1, Lx), f32)                       # bias-carrier channel
        zpad = jnp.zeros((G, Cp - C - 1, Lx), f32)
        xblk = jnp.concatenate([xblk, ones, zpad], axis=1)     # (G, Cp, Lx)
        xim = jnp.concatenate([xblk[:, :, k:k + W1w] for k in range(K1)],
                              axis=1).astype(mxu_dtype)        # (G, K1*Cp, W1w)

        out = pc(xim, w1f, w2f, wof)                           # (G, Op, W) f32

        # Column b*L + t of block g holds (sequence g*Bt+b, window t); keep t < L2.
        o = out[:, :O, :Bt * L].reshape(G, O, Bt, L)[:, :, :, :L2]
        o = o.transpose(0, 2, 3, 1).reshape(Npad * L2, O)
        return o[:N * L2]                                      # row n*L2 + t

    return forward


def reference_forward(x, params):
    """Pure numpy reference of the same forward pass (for a correctness check)."""
    w1, b1, w2, b2, wo, bo = [np.asarray(p, np.float32) for p in params]
    x = np.asarray(x, np.float32)
    N, C, L = x.shape
    K1, K2 = w1.shape[2], w2.shape[2]
    L1 = L - (K1 - 1)
    L2 = L1 - (K2 - 1)
    outs = []
    for n in range(N):
        y1 = b1 + sum(w1[:, :, k] @ x[n][:, k:k + L1] for k in range(K1))
        y1 = np.maximum(y1, 0.0)
        y2 = b2 + sum(w2[:, :, k] @ y1[:, k:k + L2] for k in range(K2))
        y2 = np.maximum(y2, 0.0)
        outs.append((wo @ y2 + bo).T)                  # (L2, O)
    return np.concatenate(outs, axis=0)                # (N*L2, O)


if __name__ == "__main__":
    # Shapes consistent with the module:
    #   num_sequence (batch) = 2, input_size (channels) = 4, seq len L = 16,
    #   window_size = 8 -> ws_out = 4, len_sequence = 9, hidden = [10], output = 3
    N, C_in, L = 2, 4, 16
    window_size = 8
    H, O = 10, 3
    K1 = 5
    K2 = window_size - (K1 - 1)   # = 4 (second conv kernel from __init__)

    key = jax.random.PRNGKey(0)
    ks = jax.random.split(key, 7)
    x = jax.random.normal(ks[0], (N, C_in, L), dtype=jnp.float32)

    # init_weights(): weights ~ N(0, 0.01); biases keep PyTorch default
    # U(-1/sqrt(fan_in), 1/sqrt(fan_in)).  Conv weights in torch layout (C_out, C_in, K).
    w1 = 0.01 * jax.random.normal(ks[1], (C_in, C_in, K1), dtype=jnp.float32)
    b1 = jax.random.uniform(ks[2], (C_in, 1), jnp.float32,
                            -1.0 / np.sqrt(C_in * K1), 1.0 / np.sqrt(C_in * K1))
    w2 = 0.01 * jax.random.normal(ks[3], (H, C_in, K2), dtype=jnp.float32)
    b2 = jax.random.uniform(ks[4], (H, 1), jnp.float32,
                            -1.0 / np.sqrt(C_in * K2), 1.0 / np.sqrt(C_in * K2))
    wo = 0.01 * jax.random.normal(ks[5], (O, H), dtype=jnp.float32)
    bo = jax.random.uniform(ks[6], (O, 1), jnp.float32,
                            -1.0 / np.sqrt(H), 1.0 / np.sqrt(H))
    params = (w1, b1, w2, b2, wo, bo)

    y_ref = reference_forward(x, params)

    # Exact f32 MXU path: tight check against the numpy reference.
    fwd_f32 = make_cnn_forward(params, x.shape, window_size, mxu_dtype=jnp.float32)
    y32 = jax.block_until_ready(fwd_f32(x))
    assert y32.shape == (N * (L - window_size + 1), O), y32.shape
    np.testing.assert_allclose(np.asarray(y32), y_ref, rtol=1e-5, atol=1e-5)

    # bf16 MXU operands (performance default on v5e/v6e/v7x): looser check.
    fwd_bf16 = make_cnn_forward(params, x.shape, window_size, mxu_dtype=jnp.bfloat16)
    ybf = jax.block_until_ready(fwd_bf16(x))
    np.testing.assert_allclose(np.asarray(ybf), y_ref, rtol=2e-2, atol=2e-2)

    # TODO(synk): bkf=True Kalman-filter branches (sequential 2Nx2N matrix inversions)
    # are dead code for the default bkf=False and are left unimplemented.
    print("KERNEL_OK")
</pallas_src>

<mosaic_0001>
module attributes {stable_mosaic.version = 11 : i64} {
  func.func @kernel(%arg0: i32, %arg1: memref<1x40x256xf32, #tpu.memory_space<vmem>>, %arg2: memref<8x40xf32, #tpu.memory_space<vmem>>, %arg3: memref<16x32xf32, #tpu.memory_space<vmem>>, %arg4: memref<8x16xf32, #tpu.memory_space<vmem>>, %arg5: memref<1x8x128xf32, #tpu.memory_space<vmem>>) attributes {dimension_semantics = [#tpu.dimension_semantics<parallel>], iteration_bounds = array<i64: 1>, scalar_prefetch = 0 : i64, scratch_operands = 0 : i64, tpu.core_type = #tpu.core_type<tc>, window_params = [{transform_indices = @transform_0, window_bounds = array<i64: 1, 40, 256>}, {pipeline_mode = #tpu.pipeline_mode<synchronous>, transform_indices = @transform_1, window_bounds = array<i64: 8, 40>}, {pipeline_mode = #tpu.pipeline_mode<synchronous>, transform_indices = @transform_2, window_bounds = array<i64: 16, 32>}, {pipeline_mode = #tpu.pipeline_mode<synchronous>, transform_indices = @transform_3, window_bounds = array<i64: 8, 16>}, {transform_indices = @transform_4, window_bounds = array<i64: 1, 8, 128>}]} {
    %c0 = arith.constant 0 : index
    %c0_0 = arith.constant 0 : index
    %0 = vector.load %arg2[%c0, %c0_0] : memref<8x40xf32, #tpu.memory_space<vmem>>, vector<8x40xf32>
    %c0_1 = arith.constant 0 : index
    %c0_2 = arith.constant 0 : index
    %c0_3 = arith.constant 0 : index
    %1 = vector.load %arg1[%c0_1, %c0_2, %c0_3] : memref<1x40x256xf32, #tpu.memory_space<vmem>>, vector<1x40x256xf32>
    %2 = vector.shape_cast %1 : vector<1x40x256xf32> to vector<40x256xf32>
    %cst = arith.constant dense<0.000000e+00> : vector<8x256xf32>
    %3 = tpu.matmul %0, %2, %cst {dimension_numbers = #tpu.dot_dimension_numbers<[1], [0], [0], [1], [0, 0, 1, 1], [], []>} : vector<8x40xf32>, vector<40x256xf32>, vector<8x256xf32> -> vector<8x256xf32>
    %cst_4 = arith.constant 0.000000e+00 : f32
    %4 = vector.broadcast %cst_4 : f32 to vector<8x256xf32>
    %5 = arith.maximumf %3, %4 : vector<8x256xf32>
    %6 = vector.extract_strided_slice %5 {offsets = [0, 0], sizes = [8, 128], strides = [1, 1]} : vector<8x256xf32> to vector<8x128xf32>
    %7 = vector.extract_strided_slice %5 {offsets = [0, 1], sizes = [8, 128], strides = [1, 1]} : vector<8x256xf32> to vector<8x128xf32>
    %8 = vector.extract_strided_slice %5 {offsets = [0, 2], sizes = [8, 128], strides = [1, 1]} : vector<8x256xf32> to vector<8x128xf32>
    %9 = vector.extract_strided_slice %5 {offsets = [0, 3], sizes = [8, 128], strides = [1, 1]} : vector<8x256xf32> to vector<8x128xf32>
    %10 = tpu.concatenate %6, %7, %8, %9 in 0 : vector<8x128xf32>, vector<8x128xf32>, vector<8x128xf32>, vector<8x128xf32> -> vector<32x128xf32>
    %c0_5 = arith.constant 0 : index
    %c0_6 = arith.constant 0 : index
    %11 = vector.load %arg3[%c0_5, %c0_6] : memref<16x32xf32, #tpu.memory_space<vmem>>, vector<16x32xf32>
    %cst_7 = arith.constant dense<0.000000e+00> : vector<16x128xf32>
    %12 = tpu.matmul %11, %10, %cst_7 {dimension_numbers = #tpu.dot_dimension_numbers<[1], [0], [0], [1], [0, 0, 1, 1], [], []>} : vector<16x32xf32>, vector<32x128xf32>, vector<16x128xf32> -> vector<16x128xf32>
    %cst_8 = arith.constant 0.000000e+00 : f32
    %13 = vector.broadcast %cst_8 : f32 to vector<16x128xf32>
    %14 = arith.maximumf %12, %13 : vector<16x128xf32>
    %c0_9 = arith.constant 0 : index
    %c0_10 = arith.constant 0 : index
    %15 = vector.load %arg4[%c0_9, %c0_10] : memref<8x16xf32, #tpu.memory_space<vmem>>, vector<8x16xf32>
    %cst_11 = arith.constant dense<0.000000e+00> : vector<8x128xf32>
    %16 = tpu.matmul %15, %14, %cst_11 {dimension_numbers = #tpu.dot_dimension_numbers<[1], [0], [0], [1], [0, 0, 1, 1], [], []>} : vector<8x16xf32>, vector<16x128xf32>, vector<8x128xf32> -> vector<8x128xf32>
    %c0_12 = arith.constant 0 : index
    %c0_13 = arith.constant 0 : index
    %c0_14 = arith.constant 0 : index
    %17 = vector.load %arg5[%c0_12, %c0_13, %c0_14] : memref<1x8x128xf32, #tpu.memory_space<vmem>>, vector<1x8x128xf32>
    %18 = vector.shape_cast %17 : vector<1x8x128xf32> to vector<8x128xf32>
    %19 = vector.shape_cast %16 : vector<8x128xf32> to vector<1x8x128xf32>
    tpu.vector_store %arg5[%c0_12, %c0_13, %c0_14], %19 {strides = array<i32>} : memref<1x8x128xf32, #tpu.memory_space<vmem>>, vector<1x8x128xf32>,
    return
  }
  func.func @transform_0(%arg0: i32) -> (i32, i32, i32) {
    %c0_i32 = arith.constant 0 : i32
    %c0_i32_0 = arith.constant 0 : i32
    %c0_i32_1 = arith.constant 0 : i32
    return %arg0, %c0_i32, %c0_i32_0 : i32, i32, i32
  }
  func.func @transform_1(%arg0: i32) -> (i32, i32) {
    %c0_i32 = arith.constant 0 : i32
    %c0_i32_0 = arith.constant 0 : i32
    %c0_i32_1 = arith.constant 0 : i32
    return %c0_i32, %c0_i32_0 : i32, i32
  }
  func.func @transform_2(%arg0: i32) -> (i32, i32) {
    %c0_i32 = arith.constant 0 : i32
    %c0_i32_0 = arith.constant 0 : i32
    %c0_i32_1 = arith.constant 0 : i32
    return %c0_i32, %c0_i32_0 : i32, i32
  }
  func.func @transform_3(%arg0: i32) -> (i32, i32) {
    %c0_i32 = arith.constant 0 : i32
    %c0_i32_0 = arith.constant 0 : i32
    %c0_i32_1 = arith.constant 0 : i32
    return %c0_i32, %c0_i32_0 : i32, i32
  }
  func.func @transform_4(%arg0: i32) -> (i32, i32, i32) {
    %c0_i32 = arith.constant 0 : i32
    %c0_i32_0 = arith.constant 0 : i32
    %c0_i32_1 = arith.constant 0 : i32
    return %arg0, %c0_i32, %c0_i32_0 : i32, i32, i32
  }
}

</mosaic_0001>

<bundles_post_ra>
// kernel: forward.1
= control target key start
LH: loop header
LB: loop body
LE: loop exit
PB: predicated region body
PF: predicated region fallthrough
CT: control target
= control target key end

     0   :  { %v365_v3 = vmov 0.0   ;;  %vm28_vm0 = vcmask 326656   ;;  %vm130_vm1 = vcmask 261120   ;;  %s367_s13 = smov 127   ;;  %vm111_vm2 = vcmask 1039360   ;;  %s445_s0 = inlined_call_operand.vmem [shape: f32[1,40,256], index: 0, kind: input, shape index: {}]   ;;  %s446_s1 = inlined_call_operand.vmem [shape: f32[8,40], index: 1, kind: input, shape index: {}]   ;;  %s447_s2 = inlined_call_operand.vmem [shape: f32[16,32], index: 2, kind: input, shape index: {}]   ;;  %s448_s3 = inlined_call_operand.vmem [shape: f32[8,16], index: 3, kind: input, shape index: {}]   ;;  %s449_s4 = inlined_call_operand.vmem [shape: f32[1,8,128], index: 4, kind: output, shape index: {}]  }
   0x1   :  { %v19_v0 = vld [vmem:[%s445_s0 + $0x8] sm:$0xff]  ;;  %v21_v1 = vld [vmem:[%s445_s0 + $0x18] sm:$0xff]  ;;  %v18_v2 = vld [vmem:[%s445_s0] sm:$0xff]  ;;  %96 = vmatprep.mubr.f32.mxu0 %v365_v3  ;;  %vm118_vm3 = vcmask 1031168   ;;  %vm125_vm4 = vcmask 1022976   ;;  %v369_v37 = vmov 0.0|0.0  }
   0x2   :  { %v325_v4 = vpack.c.bf16 %v21_v1, %v19_v0  ;;  %v20_v5 = vld [vmem:[%s445_s0 + $0x10] sm:$0xff]  ;;  %v23_v6 = vld [vmem:[%s445_s0 + $0x28] sm:$0xff]  ;;  %v25_v7 = vld [vmem:[%s445_s0 + $0x38] sm:$0xff]  ;;  %vm370_vm5 = vmmov 0   ;;  %vm215_vm6 = vcmask 130048  }
   0x3   :  { %v327_v8 = vpack.c.bf16 %v20_v5, %v18_v2  ;;  %v329_v9 = vpack.c.bf16 %v25_v7, %v23_v6  ;;  %v22_v10 = vld [vmem:[%s445_s0 + $0x20] sm:$0xff]  ;;  %v24_v11 = vld [vmem:[%s445_s0 + $0x30] sm:$0xff]  ;;  %v27_v13 = vld [vmem:[%s445_s0 + $0x48] sm:$0xff] }
   0x4   :  { %326 = vmatprep.subr.bf16.mxu0 %v325_v4  ;;  %v331_v12 = vpack.c.bf16 %v24_v11, %v22_v10  ;;  %v26_v14 = vld [vmem:[%s445_s0 + $0x40] sm:$0xff]  ;;  %s366_s0 = smov 125   ;;  %v129_v36 = vld [vmem:[%s447_s2 + $0x8] sm:$0xff] }
   0x5   :  { %328 = vmatpush1.bf16.msra.mxu0 %v327_v8  ;;  %v17_v15 = vld [vmem:[%s446_s1] sm:$0xff]  ;;  %s368_s1 = smov 126  }
   0x6   :  { %330 = vmatprep.subr.bf16.mxu0 %v329_v9  ;;  %v128_v21 = vld [vmem:[%s447_s2] sm:$0xff] }
   0x7   :  { %315 = vmatprep.mubr.msk.f32.mxu1 %vm130_vm1, %v128_v21  ;;  %v214_v43 = vld [vmem:[%s448_s3] sm:$0xff] }
   0x9   :  { %332 = vmatpush1.bf16.msra.mxu0 %v331_v12 }
   0xa   :  { %40 = vmatprep.subr.mxu0 %v27_v13 }
   0xd   :  { %41 = vmatpush1.msra.mxu0 %v26_v14 }
   0xe   :  { %294 = vmatmul.mubr.msk.f32.vlgmr.msra.gmra.mrb[0].mxu0 %vm28_vm0, %v17_v15 }
  0xe1   :  { %v98_v16 = vpop.f32.mrb[0].mxu0 }
  0xe2   :  { %v103_v17 = vmax.f32 %v98_v16, 0.0  ;;  %v100_v18 = vpop.f32.mrb[1].mxu0 }
  0xe3   :  { %v104_v19 = vmax.f32 %v100_v18, 0.0 }
  0xe5   :  { %v360_v20 = vpack.i.bf16 %v104_v19, %v103_v17 }
  0xe7   :  { %361 = vrot.lane.b32.xlu1 %v360_v20, %s366_s0  ;;  %351 = vrot.lane.b32.xlu0 %v360_v20, %s367_s13 }
  0xeb   :  { %356 = vrot.lane.b32.xlu0 %v360_v20, %s368_s1 }
 0x159   :  { %v362_v22 = vpop.permute.xlu1 %361  ;;  %v352_v23 = vpop.permute.xlu0 %351 }
 0x15a   :  { %v354_v24 = vunpack.i.h.bf16 %v352_v23  ;;  %v353_v25 = vunpack.i.l.bf16 %v352_v23  ;;  %v364_v26 = vunpack.i.h.bf16 %v362_v22  ;;  %v363_v27 = vunpack.i.l.bf16 %v362_v22 }
 0x15c   :  { %v112_v28 = vsel %vm111_vm2, %v353_v25, %v354_v24  ;;  %v126_v34 = vsel %vm125_vm4, %v363_v27, %v364_v26 }
 0x15d   :  { %v357_v29 = vpop.permute.xlu0 %356  ;;  %v333_v30 = vpack.c.bf16 %v112_v28, %v103_v17 }
 0x15e   :  { %v359_v31 = vunpack.i.h.bf16 %v357_v29  ;;  %v358_v32 = vunpack.i.l.bf16 %v357_v29 }
 0x15f   :  { %334 = vmatprep.subr.bf16.mxu1 %v333_v30 }
 0x160   :  { %336 = vmatpush3.bf16.msra.mxu1 %v333_v30  ;;  %v119_v33 = vsel %vm118_vm3, %v358_v32, %v359_v31 }
 0x161   :  { %v337_v35 = vpack.c.bf16 %v126_v34, %v119_v33 }
 0x163   :  { %338 = vmatprep.subr.bf16.mxu1 %v337_v35 }
 0x164   :  { %340 = vmatpush3.bf16.msra.mxu1 %v337_v35 }
 0x165   :  { %341 = vmatprep.subr.bf16.mxu1 %v369_v37 }
 0x167   :  { %316 = vmatmul.mubr.msk.f32.vlgmr.msra.gmra.mrb[0].mxu1 %vm130_vm1, %v129_v36 }
 0x168   :  { %322 = vmatprep.mubr.msk.f32.mxu1 %vm370_vm5, %v365_v3 }
 0x23a   :  { %v317_v38 = vpop.f32.mrb[0].mxu1 }
 0x23b   :  { %v213_v39 = vmax.f32 %v317_v38, 0.0  ;;  %v203_v40 = vpop.f32.mrb[1].mxu1 }
 0x23c   :  { %v212_v41 = vmax.f32 %v203_v40, 0.0 }
 0x23e   :  { %v342_v42 = vpack.c.bf16 %v213_v39, %v212_v41 }
 0x240   :  { %343 = vmatpush3.bf16.msra.mxu1 %v342_v42 }
 0x243   :  { %323 = vmatmul.mubr.msk.f32.vlgmr.msra.gmra.mrb[2].mxu1 %vm215_vm6, %v214_v43 }
 0x316   :  { %v285_v44 = vpop.f32.mrb[2].mxu1 }
 0x317   :  { %289 = vst [vmem:[%s449_s4] sm:$0xff] %v285_v44  ;;  %v324_v45 = vpop.f32.mrb[3].mxu1 }

</bundles_post_ra>
